<compile_context>
chip_gen: v5e
topology: v5e:2x2
jax: 0.10.0
libtpu: 0.0.40
codegen_flags: <defaults>
</compile_context>

<pallas_src>
import jax
import jax.numpy as jnp
from jax.experimental import pallas as pl
from jax.experimental.pallas import tpu as pltpu


def _rup(x, m):
    return (x + m - 1) // m * m


def _vmem_budget_bytes():
    """Generation-aware VMEM budget (~75% of physical; 48 MiB fallback)."""
    try:
        cap = int(pltpu.get_tpu_info().vmem_capacity_bytes)
        return max(32 * 1024 * 1024, (cap * 3) // 4)
    except Exception:
        return 48 * 1024 * 1024


def make_conv_relu_stats_kernel(*, K, stride, dilation, TM, T_out, n_t):
    rows_last = T_out - (n_t - 1) * TM     # valid rows in the final time tile
    need_mask = rows_last != TM            # static: mask only if time padding exists

    def kernel(x_ref, w_ref, b_ref, y_ref, s_ref, ss_ref):
        j = pl.program_id(1)
        c_out_p = w_ref.shape[-1]

        base = pl.multiple_of(j * (TM * stride), 8)

        # Conv1d as K accumulated shifted matmuls (MXU operands in the compute
        # dtype, f32 accumulator).  No K-fold unfold is materialized in HBM.
        # TODO(synk): for small C_in (layer-1 regime) fold the K taps into one
        #             (TM, K*C_in) @ (K*C_in, C_out) matmul via an in-VMEM
        #             lane concat once unaligned minor-dim concatenation
        #             lowering is verified on all target generations.
        acc = jnp.zeros((TM, c_out_p), jnp.float32)
        for k in range(K):
            start = base + k * dilation
            if stride == 1:
                xk = x_ref[0, pl.ds(start, TM), :]
            else:
                # TODO(synk): stride>1 uses K strided sublane loads; a single
                #             contiguous halo load + in-register selection
                #             would reduce vld/XLU pressure.
                xk = x_ref[0, pl.ds(start, TM, stride), :]
            acc = acc + jnp.dot(xk, w_ref[k],
                                preferred_element_type=jnp.float32)

        y = jnp.maximum(acc + b_ref[...], 0.0)   # bias + ReLU (f32)

        # Per-batch partial BatchNorm statistics, accumulated directly in the
        # resident (1, 1, C) output block (reduction axis j is last in the
        # grid).  This keeps the batch axis free to run "parallel".
        @pl.when(j == 0)
        def _():
            s_ref[...] = jnp.zeros(s_ref.shape, s_ref.dtype)
            ss_ref[...] = jnp.zeros(ss_ref.shape, ss_ref.dtype)

        def accum(yv):
            rs = jnp.sum(yv, axis=0, keepdims=True)           # (1, C)
            rss = jnp.sum(yv * yv, axis=0, keepdims=True)     # (1, C)
            s_ref[...] += rs.reshape(1, 1, c_out_p)
            ss_ref[...] += rss.reshape(1, 1, c_out_p)

        if need_mask:
            # Only the last time tile of each batch carries padded rows; keep
            # the iota + select off the common path.
            @pl.when(j < n_t - 1)
            def _():
                accum(y)

            @pl.when(j == n_t - 1)
            def _():
                row = jax.lax.broadcasted_iota(jnp.int32, (TM, 1), 0)
                accum(jnp.where(row < rows_last, y, 0.0))
        else:
            accum(y)

        # Intermediate y stored in compute dtype (bf16 by default): halves the
        # post-conv HBM traffic.  Partial last block store is masked by Pallas.
        y_ref[0, :, :] = y.astype(y_ref.dtype)

    return kernel


def bn_apply_kernel(y_ref, scale_ref, shift_ref, o_ref):
    # Fused BatchNorm affine: upcast the (bf16) intermediate, one FMA per
    # element, write straight into the un-padded output (no trailing slice).
    yv = y_ref[0, :, :].astype(jnp.float32)
    o_ref[0, :, :] = (yv * scale_ref[...] + shift_ref[...]).astype(o_ref.dtype)


def tdnn_forward(x, weight, bias, gamma, beta, *, context_size, stride=1,
                 dilation=1, eps=1e-5, compute_dtype=jnp.bfloat16,
                 row_tile=512):
    """x: [B, T, C_in]; weight: [C_out, C_in, K] (PyTorch Conv1d layout)."""
    B, T, C_in = x.shape
    C_out, C_in_w, K = weight.shape
    assert K == context_size and C_in_w == C_in

    T_out = (T - dilation * (K - 1) - 1) // stride + 1
    assert T_out > 0

    itemsize = jnp.dtype(compute_dtype).itemsize
    sub = 16 if itemsize == 2 else 8            # sublane-friendly tile quantum
    C_out_p = _rup(C_out, 128)                  # lane-dense output channels

    # --- VMEM-budget-aware tile selection (v7x 64 MiB aware) ---
    budget = _vmem_budget_bytes()
    TM = min(_rup(T_out, sub), _rup(max(row_tile, sub), sub))
    while True:
        n_t = -(-T_out // TM)                   # time tiles per batch
        TP = n_t * TM                           # conv-output extent actually computed
        Tx = max(T, (TP - 1) * stride + dilation * (K - 1) + 1)  # padded input time
        need = (2 * Tx * _rup(C_in, 128) * itemsize        # resident x block (dbuf, lane-padded)
                + 2 * K * _rup(C_in, 8) * C_out_p * itemsize   # weights (dbuf)
                + 2 * TM * C_out_p * itemsize              # y output block (dbuf)
                + 2 * TM * C_out_p * 4                     # f32 accumulator / temps
                + 16 * C_out_p * 4)                        # stats blocks + bias
        if need <= budget or TM <= sub:
            break
        TM = max(sub, _rup(TM // 2, sub))
    vmem_limit = int(min(budget, max(need + (4 << 20), 32 << 20)))
    # TODO(synk): for very long utterances where the x block alone exceeds the
    #             budget (e.g. v7x's 64 MiB VMEM), switch x to
    #             memory_space=pl.ANY with a manually double-buffered
    #             (TM*stride + dilation*(K-1)) halo-window DMA per time tile.
    # TODO(synk): weight/bias BlockSpecs have constant index maps and could use
    #             pipeline_mode=pl.Buffered(1) to save VMEM on v7x.

    # --- cheap JAX glue: pad + cast, no unfold ---
    xp = jnp.pad(x, ((0, 0), (0, Tx - T), (0, 0))).astype(compute_dtype)
    # PyTorch weight (C_out, C_in, K) -> (K, C_in, C_out_p)
    w = jnp.transpose(weight, (2, 1, 0))
    w = jnp.pad(w, ((0, 0), (0, 0), (0, C_out_p - C_out))).astype(compute_dtype)
    b2 = jnp.pad(bias, (0, C_out_p - C_out)).reshape(1, C_out_p).astype(jnp.float32)

    kernel1 = make_conv_relu_stats_kernel(
        K=K, stride=stride, dilation=dilation, TM=TM, T_out=T_out, n_t=n_t)

    cost1 = pl.CostEstimate(
        flops=2 * B * TP * K * C_in * C_out_p,
        transcendentals=0,
        bytes_accessed=((B * Tx * C_in + K * C_in * C_out_p) * itemsize
                        + B * T_out * C_out_p * itemsize
                        + 2 * B * C_out_p * 4))

    y, s, ss = pl.pallas_call(
        kernel1,
        out_shape=(
            jax.ShapeDtypeStruct((B, T_out, C_out_p), compute_dtype),  # y (bf16 by default)
            jax.ShapeDtypeStruct((B, 1, C_out_p), jnp.float32),        # per-batch sum
            jax.ShapeDtypeStruct((B, 1, C_out_p), jnp.float32),        # per-batch sum of squares
        ),
        grid=(B, n_t),
        in_specs=[
            # raw x, one batch at a time; resident (no re-DMA) across time tiles
            pl.BlockSpec((1, Tx, C_in), lambda b, j: (b, 0, 0)),
            pl.BlockSpec((K, C_in, C_out_p), lambda b, j: (0, 0, 0)),
            pl.BlockSpec((1, C_out_p), lambda b, j: (0, 0)),
        ],
        out_specs=(
            pl.BlockSpec((1, TM, C_out_p), lambda b, j: (b, j, 0)),
            pl.BlockSpec((1, 1, C_out_p), lambda b, j: (b, 0, 0)),
            pl.BlockSpec((1, 1, C_out_p), lambda b, j: (b, 0, 0)),
        ),
        compiler_params=pltpu.CompilerParams(
            # per-batch partial stats -> batch axis can shard across cores
            # (v7x 2 TCs); the time axis carries the stats accumulation.
            dimension_semantics=("parallel", "arbitrary"),
            vmem_limit_bytes=vmem_limit),
        cost_estimate=cost1,
    )(xp, w, b2)

    # --- BN stats -> fused per-channel scale/shift (tiny, plain JAX) ---
    n = float(B * T_out)
    s_tot = jnp.sum(s, axis=0)                      # (1, C_out_p)
    ss_tot = jnp.sum(ss, axis=0)                    # (1, C_out_p)
    mean = s_tot / n
    var = jnp.maximum(ss_tot / n - mean * mean, 0.0)  # biased variance, clamp cancellation
    g2 = jnp.pad(gamma, (0, C_out_p - C_out)).reshape(1, C_out_p).astype(jnp.float32)
    be2 = jnp.pad(beta, (0, C_out_p - C_out)).reshape(1, C_out_p).astype(jnp.float32)
    scale = g2 * jax.lax.rsqrt(var + eps)
    shift = be2 - mean * scale

    # --- pass 2: tiled elementwise normalize, writing the un-padded output ---
    cost2 = pl.CostEstimate(
        flops=2 * B * T_out * C_out_p,
        transcendentals=0,
        bytes_accessed=B * T_out * C_out_p * (itemsize + 4) + 2 * C_out_p * 4)

    out = pl.pallas_call(
        bn_apply_kernel,
        out_shape=jax.ShapeDtypeStruct((B, T_out, C_out_p), jnp.float32),
        grid=(B, n_t),
        in_specs=[
            pl.BlockSpec((1, TM, C_out_p), lambda b, j: (b, j, 0)),
            pl.BlockSpec((1, C_out_p), lambda b, j: (0, 0)),
            pl.BlockSpec((1, C_out_p), lambda b, j: (0, 0)),
        ],
        out_specs=pl.BlockSpec((1, TM, C_out_p), lambda b, j: (b, j, 0)),
        compiler_params=pltpu.CompilerParams(
            dimension_semantics=("parallel", "parallel"),
            vmem_limit_bytes=vmem_limit),
        cost_estimate=cost2,
    )(y, scale, shift)

    # Channel un-pad only when C_out is not already lane-dense (128-multiple);
    # typical TDNN layers (C_out=512) skip this entirely.
    if C_out_p != C_out:
        out = out[:, :, :C_out]
    return out


def tdnn_reference(x, weight, bias, gamma, beta, *, context_size, stride,
                   dilation, eps=1e-5):
    """Pure-JAX f32 reference for correctness checking."""
    B, T, C_in = x.shape
    C_out, _, K = weight.shape
    T_out = (T - dilation * (K - 1) - 1) // stride + 1
    t_idx = jnp.arange(T_out) * stride
    k_idx = jnp.arange(K) * dilation
    patches = x[:, t_idx[:, None] + k_idx[None, :], :]          # [B,T_out,K,C_in]
    y = jnp.einsum("btkc,ock->bto", patches, weight) + bias     # conv1d
    y = jnp.maximum(y, 0.0)                                     # ReLU
    mean = jnp.mean(y, axis=(0, 1), keepdims=True)              # BN (train mode)
    var = jnp.mean((y - mean) ** 2, axis=(0, 1), keepdims=True)
    y = (y - mean) * jax.lax.rsqrt(var + eps)
    return y * gamma + beta


if __name__ == "__main__":
    def run_case(B, T, C_in, C_out, K, stride, dilation, row_tile, key):
        kx, kw, kb, kg, kbe = jax.random.split(key, 5)
        x = jax.random.normal(kx, (B, T, C_in), dtype=jnp.float32)

        # Deterministic parameter init (Conv1d-style uniform; random BN affine).
        fan_in = C_in * K
        bound = 1.0 / (fan_in ** 0.5)
        weight = jax.random.uniform(kw, (C_out, C_in, K), jnp.float32, -bound, bound)
        bias = jax.random.uniform(kb, (C_out,), jnp.float32, -bound, bound)
        gamma = jax.random.uniform(kg, (C_out,), jnp.float32, 0.5, 1.5)
        beta = 0.1 * jax.random.normal(kbe, (C_out,), jnp.float32)

        T_out = (T - dilation * (K - 1) - 1) // stride + 1
        ref = tdnn_reference(x, weight, bias, gamma, beta,
                             context_size=K, stride=stride, dilation=dilation)

        # f32 compute path: tight check against the f32 reference.
        out_f32 = tdnn_forward(x, weight, bias, gamma, beta,
                               context_size=K, stride=stride, dilation=dilation,
                               compute_dtype=jnp.float32, row_tile=row_tile)
        out_f32 = jax.block_until_ready(out_f32)
        assert out_f32.shape == (B, T_out, C_out)
        assert jnp.allclose(out_f32, ref, atol=1e-4, rtol=1e-4)

        # bf16 MXU path (default, performance mode): loose check vs f32 reference.
        out_bf = tdnn_forward(x, weight, bias, gamma, beta,
                              context_size=K, stride=stride, dilation=dilation,
                              compute_dtype=jnp.bfloat16, row_tile=row_tile)
        out_bf = jax.block_until_ready(out_bf)
        assert out_bf.shape == (B, T_out, C_out)
        assert jnp.allclose(out_bf, ref, atol=5e-2, rtol=5e-2)

    k1, k2 = jax.random.split(jax.random.PRNGKey(0))
    # Small, TDNN-consistent shapes (single time tile).
    run_case(B=2, T=16, C_in=8, C_out=32, K=5, stride=1, dilation=1,
             row_tile=512, key=k1)
    # Multi-tile + dilation + masked (partial) last tile: exercises the
    # per-batch stats accumulation, the gated mask path, and partial blocks.
    run_case(B=2, T=64, C_in=24, C_out=96, K=5, stride=1, dilation=2,
             row_tile=16, key=k2)

    print("KERNEL_OK")
</pallas_src>

<mosaic_0001>
module attributes {stable_mosaic.version = 11 : i64} {
  func.func @kernel(%arg0: i32, %arg1: i32, %arg2: memref<1x20x8xf32, #tpu.memory_space<vmem>>, %arg3: memref<5x8x128xf32, #tpu.memory_space<vmem>>, %arg4: memref<1x128xf32, #tpu.memory_space<vmem>>, %arg5: memref<1x16x128xf32, #tpu.memory_space<vmem>>, %arg6: memref<1x1x128xf32, #tpu.memory_space<vmem>>, %arg7: memref<1x1x128xf32, #tpu.memory_space<vmem>>) attributes {dimension_semantics = [#tpu.dimension_semantics<parallel>, #tpu.dimension_semantics<arbitrary>], iteration_bounds = array<i64: 2, 1>, scalar_prefetch = 0 : i64, scratch_operands = 0 : i64, tpu.core_type = #tpu.core_type<tc>, window_params = [{transform_indices = @transform_0, window_bounds = array<i64: 1, 20, 8>}, {pipeline_mode = #tpu.pipeline_mode<synchronous>, transform_indices = @transform_1, window_bounds = array<i64: 5, 8, 128>}, {pipeline_mode = #tpu.pipeline_mode<synchronous>, transform_indices = @transform_2, window_bounds = array<i64: 1, 128>}, {transform_indices = @transform_3, window_bounds = array<i64: 1, 16, 128>}, {transform_indices = @transform_4, window_bounds = array<i64: 1, 1, 128>}, {transform_indices = @transform_5, window_bounds = array<i64: 1, 1, 128>}]} {
    %c16_i32 = arith.constant 16 : i32
    %0 = arith.muli %arg1, %c16_i32 : i32
    %1 = tpu.assume_multiple %0, 8 : i32
    %cst = arith.constant 0.000000e+00 : f32
    %2 = vector.broadcast %cst : f32 to vector<16x128xf32>
    %c0_i32 = arith.constant 0 : i32
    %3 = arith.addi %1, %c0_i32 : i32
    %c0 = arith.constant 0 : index
    %4 = arith.index_cast %3 : i32 to index
    %c0_0 = arith.constant 0 : index
    %5 = vector.load %arg2[%c0, %4, %c0_0] : memref<1x20x8xf32, #tpu.memory_space<vmem>>, vector<1x16x8xf32>
    %6 = vector.shape_cast %5 : vector<1x16x8xf32> to vector<16x8xf32>
    %c0_1 = arith.constant 0 : index
    %c0_2 = arith.constant 0 : index
    %c0_3 = arith.constant 0 : index
    %7 = vector.load %arg3[%c0_1, %c0_2, %c0_3] : memref<5x8x128xf32, #tpu.memory_space<vmem>>, vector<1x8x128xf32>
    %8 = vector.shape_cast %7 : vector<1x8x128xf32> to vector<8x128xf32>
    %cst_4 = arith.constant dense<0.000000e+00> : vector<16x128xf32>
    %9 = tpu.matmul %6, %8, %cst_4 {dimension_numbers = #tpu.dot_dimension_numbers<[1], [0], [0], [1], [0, 0, 1, 1], [], []>} : vector<16x8xf32>, vector<8x128xf32>, vector<16x128xf32> -> vector<16x128xf32>
    %10 = arith.addf %2, %9 : vector<16x128xf32>
    %c1_i32 = arith.constant 1 : i32
    %11 = arith.addi %1, %c1_i32 : i32
    %c0_5 = arith.constant 0 : index
    %12 = arith.index_cast %11 : i32 to index
    %c0_6 = arith.constant 0 : index
    %13 = vector.load %arg2[%c0_5, %12, %c0_6] : memref<1x20x8xf32, #tpu.memory_space<vmem>>, vector<1x16x8xf32>
    %14 = vector.shape_cast %13 : vector<1x16x8xf32> to vector<16x8xf32>
    %c1 = arith.constant 1 : index
    %c0_7 = arith.constant 0 : index
    %c0_8 = arith.constant 0 : index
    %15 = vector.load %arg3[%c1, %c0_7, %c0_8] : memref<5x8x128xf32, #tpu.memory_space<vmem>>, vector<1x8x128xf32>
    %16 = vector.shape_cast %15 : vector<1x8x128xf32> to vector<8x128xf32>
    %cst_9 = arith.constant dense<0.000000e+00> : vector<16x128xf32>
    %17 = tpu.matmul %14, %16, %cst_9 {dimension_numbers = #tpu.dot_dimension_numbers<[1], [0], [0], [1], [0, 0, 1, 1], [], []>} : vector<16x8xf32>, vector<8x128xf32>, vector<16x128xf32> -> vector<16x128xf32>
    %18 = arith.addf %10, %17 : vector<16x128xf32>
    %c2_i32 = arith.constant 2 : i32
    %19 = arith.addi %1, %c2_i32 : i32
    %c0_10 = arith.constant 0 : index
    %20 = arith.index_cast %19 : i32 to index
    %c0_11 = arith.constant 0 : index
    %21 = vector.load %arg2[%c0_10, %20, %c0_11] : memref<1x20x8xf32, #tpu.memory_space<vmem>>, vector<1x16x8xf32>
    %22 = vector.shape_cast %21 : vector<1x16x8xf32> to vector<16x8xf32>
    %c2 = arith.constant 2 : index
    %c0_12 = arith.constant 0 : index
    %c0_13 = arith.constant 0 : index
    %23 = vector.load %arg3[%c2, %c0_12, %c0_13] : memref<5x8x128xf32, #tpu.memory_space<vmem>>, vector<1x8x128xf32>
    %24 = vector.shape_cast %23 : vector<1x8x128xf32> to vector<8x128xf32>
    %cst_14 = arith.constant dense<0.000000e+00> : vector<16x128xf32>
    %25 = tpu.matmul %22, %24, %cst_14 {dimension_numbers = #tpu.dot_dimension_numbers<[1], [0], [0], [1], [0, 0, 1, 1], [], []>} : vector<16x8xf32>, vector<8x128xf32>, vector<16x128xf32> -> vector<16x128xf32>
    %26 = arith.addf %18, %25 : vector<16x128xf32>
    %c3_i32 = arith.constant 3 : i32
    %27 = arith.addi %1, %c3_i32 : i32
    %c0_15 = arith.constant 0 : index
    %28 = arith.index_cast %27 : i32 to index
    %c0_16 = arith.constant 0 : index
    %29 = vector.load %arg2[%c0_15, %28, %c0_16] : memref<1x20x8xf32, #tpu.memory_space<vmem>>, vector<1x16x8xf32>
    %30 = vector.shape_cast %29 : vector<1x16x8xf32> to vector<16x8xf32>
    %c3 = arith.constant 3 : index
    %c0_17 = arith.constant 0 : index
    %c0_18 = arith.constant 0 : index
    %31 = vector.load %arg3[%c3, %c0_17, %c0_18] : memref<5x8x128xf32, #tpu.memory_space<vmem>>, vector<1x8x128xf32>
    %32 = vector.shape_cast %31 : vector<1x8x128xf32> to vector<8x128xf32>
    %cst_19 = arith.constant dense<0.000000e+00> : vector<16x128xf32>
    %33 = tpu.matmul %30, %32, %cst_19 {dimension_numbers = #tpu.dot_dimension_numbers<[1], [0], [0], [1], [0, 0, 1, 1], [], []>} : vector<16x8xf32>, vector<8x128xf32>, vector<16x128xf32> -> vector<16x128xf32>
    %34 = arith.addf %26, %33 : vector<16x128xf32>
    %c4_i32 = arith.constant 4 : i32
    %35 = arith.addi %1, %c4_i32 : i32
    %c0_20 = arith.constant 0 : index
    %36 = arith.index_cast %35 : i32 to index
    %c0_21 = arith.constant 0 : index
    %37 = vector.load %arg2[%c0_20, %36, %c0_21] : memref<1x20x8xf32, #tpu.memory_space<vmem>>, vector<1x16x8xf32>
    %38 = vector.shape_cast %37 : vector<1x16x8xf32> to vector<16x8xf32>
    %c4 = arith.constant 4 : index
    %c0_22 = arith.constant 0 : index
    %c0_23 = arith.constant 0 : index
    %39 = vector.load %arg3[%c4, %c0_22, %c0_23] : memref<5x8x128xf32, #tpu.memory_space<vmem>>, vector<1x8x128xf32>
    %40 = vector.shape_cast %39 : vector<1x8x128xf32> to vector<8x128xf32>
    %cst_24 = arith.constant dense<0.000000e+00> : vector<16x128xf32>
    %41 = tpu.matmul %38, %40, %cst_24 {dimension_numbers = #tpu.dot_dimension_numbers<[1], [0], [0], [1], [0, 0, 1, 1], [], []>} : vector<16x8xf32>, vector<8x128xf32>, vector<16x128xf32> -> vector<16x128xf32>
    %42 = arith.addf %34, %41 : vector<16x128xf32>
    %c0_25 = arith.constant 0 : index
    %c0_26 = arith.constant 0 : index
    %43 = vector.load %arg4[%c0_25, %c0_26] : memref<1x128xf32, #tpu.memory_space<vmem>>, vector<1x128xf32>
    %44 = vector.broadcast %43 : vector<1x128xf32> to vector<16x128xf32>
    %45 = arith.addf %42, %44 : vector<16x128xf32>
    %cst_27 = arith.constant 0.000000e+00 : f32
    %46 = vector.broadcast %cst_27 : f32 to vector<16x128xf32>
    %47 = arith.maximumf %45, %46 : vector<16x128xf32>
    %c0_i32_28 = arith.constant 0 : i32
    %48 = arith.cmpi eq, %arg1, %c0_i32_28 : i32
    %49 = arith.extui %48 : i1 to i32
    %c0_i32_29 = arith.constant 0 : i32
    %50 = arith.cmpi ne, %49, %c0_i32_29 : i32
    scf.if %50 {
      %cst_37 = arith.constant 0.000000e+00 : f32
      %60 = vector.broadcast %cst_37 : f32 to vector<1x1x128xf32>
      %c0_38 = arith.constant 0 : index
      %c0_39 = arith.constant 0 : index
      %c0_40 = arith.constant 0 : index
      %61 = vector.load %arg6[%c0_38, %c0_39, %c0_40] : memref<1x1x128xf32, #tpu.memory_space<vmem>>, vector<1x1x128xf32>
      tpu.vector_store %arg6[%c0_38, %c0_39, %c0_40], %60 {strides = array<i32>} : memref<1x1x128xf32, #tpu.memory_space<vmem>>, vector<1x1x128xf32>,
      %cst_41 = arith.constant 0.000000e+00 : f32
      %62 = vector.broadcast %cst_41 : f32 to vector<1x1x128xf32>
      %c0_42 = arith.constant 0 : index
      %c0_43 = arith.constant 0 : index
      %c0_44 = arith.constant 0 : index
      %63 = vector.load %arg7[%c0_42, %c0_43, %c0_44] : memref<1x1x128xf32, #tpu.memory_space<vmem>>, vector<1x1x128xf32>
      tpu.vector_store %arg7[%c0_42, %c0_43, %c0_44], %62 {strides = array<i32>} : memref<1x1x128xf32, #tpu.memory_space<vmem>>, vector<1x1x128xf32>,
    } else {
    }
    %c0_i32_30 = arith.constant 0 : i32
    %51 = arith.cmpi slt, %arg1, %c0_i32_30 : i32
    %52 = arith.extui %51 : i1 to i32
    %c0_i32_31 = arith.constant 0 : i32
    %53 = arith.cmpi ne, %52, %c0_i32_31 : i32
    scf.if %53 {
      %cst_37 = arith.constant dense<0.000000e+00> : vector<128xf32>
      %60 = vector.multi_reduction <add>, %47, %cst_37 [0] : vector<16x128xf32> to vector<128xf32>
      %61 = vector.shape_cast %60 : vector<128xf32> to vector<1x128xf32>
      %62 = arith.mulf %47, %47 : vector<16x128xf32>
      %cst_38 = arith.constant dense<0.000000e+00> : vector<128xf32>
      %63 = vector.multi_reduction <add>, %62, %cst_38 [0] : vector<16x128xf32> to vector<128xf32>
      %64 = vector.shape_cast %63 : vector<128xf32> to vector<1x128xf32>
      %c0_39 = arith.constant 0 : index
      %c0_40 = arith.constant 0 : index
      %c0_41 = arith.constant 0 : index
      %65 = vector.load %arg6[%c0_39, %c0_40, %c0_41] : memref<1x1x128xf32, #tpu.memory_space<vmem>>, vector<1x1x128xf32>
      %66 = vector.shape_cast %61 : vector<1x128xf32> to vector<1x1x128xf32>
      %67 = arith.addf %65, %66 : vector<1x1x128xf32>
      %c0_42 = arith.constant 0 : index
      %c0_43 = arith.constant 0 : index
      %c0_44 = arith.constant 0 : index
      %68 = vector.load %arg6[%c0_42, %c0_43, %c0_44] : memref<1x1x128xf32, #tpu.memory_space<vmem>>, vector<1x1x128xf32>
      tpu.vector_store %arg6[%c0_42, %c0_43, %c0_44], %67 {strides = array<i32>} : memref<1x1x128xf32, #tpu.memory_space<vmem>>, vector<1x1x128xf32>,
      %c0_45 = arith.constant 0 : index
      %c0_46 = arith.constant 0 : index
      %c0_47 = arith.constant 0 : index
      %69 = vector.load %arg7[%c0_45, %c0_46, %c0_47] : memref<1x1x128xf32, #tpu.memory_space<vmem>>, vector<1x1x128xf32>
      %70 = vector.shape_cast %64 : vector<1x128xf32> to vector<1x1x128xf32>
      %71 = arith.addf %69, %70 : vector<1x1x128xf32>
      %c0_48 = arith.constant 0 : index
      %c0_49 = arith.constant 0 : index
      %c0_50 = arith.constant 0 : index
      %72 = vector.load %arg7[%c0_48, %c0_49, %c0_50] : memref<1x1x128xf32, #tpu.memory_space<vmem>>, vector<1x1x128xf32>
      tpu.vector_store %arg7[%c0_48, %c0_49, %c0_50], %71 {strides = array<i32>} : memref<1x1x128xf32, #tpu.memory_space<vmem>>, vector<1x1x128xf32>,
    } else {
    }
    %c0_i32_32 = arith.constant 0 : i32
    %54 = arith.cmpi eq, %arg1, %c0_i32_32 : i32
    %55 = arith.extui %54 : i1 to i32
    %c0_i32_33 = arith.constant 0 : i32
    %56 = arith.cmpi ne, %55, %c0_i32_33 : i32
    scf.if %56 {
      %60 = tpu.iota {dimensions = array<i32: 0>} : vector<16x1xi32>
      %c12_i32 = arith.constant 12 : i32
      %61 = vector.broadcast %c12_i32 : i32 to vector<16x1xi32>
      %62 = arith.cmpi slt, %60, %61 : vector<16x1xi32>
      %cst_37 = arith.constant 0.000000e+00 : f32
      %63 = vector.shape_cast %62 : vector<16x1xi1> to vector<16x1xi1>
      %64 = vector.broadcast %63 : vector<16x1xi1> to vector<16x128xi1>
      %65 = vector.broadcast %cst_37 : f32 to vector<16x128xf32>
      %66 = arith.select %64, %47, %65 : vector<16x128xi1>, vector<16x128xf32>
      %cst_38 = arith.constant dense<0.000000e+00> : vector<128xf32>
      %67 = vector.multi_reduction <add>, %66, %cst_38 [0] : vector<16x128xf32> to vector<128xf32>
      %68 = vector.shape_cast %67 : vector<128xf32> to vector<1x128xf32>
      %69 = arith.mulf %66, %66 : vector<16x128xf32>
      %cst_39 = arith.constant dense<0.000000e+00> : vector<128xf32>
      %70 = vector.multi_reduction <add>, %69, %cst_39 [0] : vector<16x128xf32> to vector<128xf32>
      %71 = vector.shape_cast %70 : vector<128xf32> to vector<1x128xf32>
      %c0_40 = arith.constant 0 : index
      %c0_41 = arith.constant 0 : index
      %c0_42 = arith.constant 0 : index
      %72 = vector.load %arg6[%c0_40, %c0_41, %c0_42] : memref<1x1x128xf32, #tpu.memory_space<vmem>>, vector<1x1x128xf32>
      %73 = vector.shape_cast %68 : vector<1x128xf32> to vector<1x1x128xf32>
      %74 = arith.addf %72, %73 : vector<1x1x128xf32>
      %c0_43 = arith.constant 0 : index
      %c0_44 = arith.constant 0 : index
      %c0_45 = arith.constant 0 : index
      %75 = vector.load %arg6[%c0_43, %c0_44, %c0_45] : memref<1x1x128xf32, #tpu.memory_space<vmem>>, vector<1x1x128xf32>
      tpu.vector_store %arg6[%c0_43, %c0_44, %c0_45], %74 {strides = array<i32>} : memref<1x1x128xf32, #tpu.memory_space<vmem>>, vector<1x1x128xf32>,
      %c0_46 = arith.constant 0 : index
      %c0_47 = arith.constant 0 : index
      %c0_48 = arith.constant 0 : index
      %76 = vector.load %arg7[%c0_46, %c0_47, %c0_48] : memref<1x1x128xf32, #tpu.memory_space<vmem>>, vector<1x1x128xf32>
      %77 = vector.shape_cast %71 : vector<1x128xf32> to vector<1x1x128xf32>
      %78 = arith.addf %76, %77 : vector<1x1x128xf32>
      %c0_49 = arith.constant 0 : index
      %c0_50 = arith.constant 0 : index
      %c0_51 = arith.constant 0 : index
      %79 = vector.load %arg7[%c0_49, %c0_50, %c0_51] : memref<1x1x128xf32, #tpu.memory_space<vmem>>, vector<1x1x128xf32>
      tpu.vector_store %arg7[%c0_49, %c0_50, %c0_51], %78 {strides = array<i32>} : memref<1x1x128xf32, #tpu.memory_space<vmem>>, vector<1x1x128xf32>,
    } else {
    }
    %c0_34 = arith.constant 0 : index
    %c0_35 = arith.constant 0 : index
    %c0_36 = arith.constant 0 : index
    %57 = vector.load %arg5[%c0_34, %c0_35, %c0_36] : memref<1x16x128xf32, #tpu.memory_space<vmem>>, vector<1x16x128xf32>
    %58 = vector.shape_cast %57 : vector<1x16x128xf32> to vector<16x128xf32>
    %59 = vector.shape_cast %47 : vector<16x128xf32> to vector<1x16x128xf32>
    tpu.vector_store %arg5[%c0_34, %c0_35, %c0_36], %59 {strides = array<i32>} : memref<1x16x128xf32, #tpu.memory_space<vmem>>, vector<1x16x128xf32>,
    return
  }
  func.func @transform_0(%arg0: i32, %arg1: i32) -> (i32, i32, i32) {
    %c0_i32 = arith.constant 0 : i32
    %c0_i32_0 = arith.constant 0 : i32
    %c0_i32_1 = arith.constant 0 : i32
    return %arg0, %c0_i32, %c0_i32_0 : i32, i32, i32
  }
  func.func @transform_1(%arg0: i32, %arg1: i32) -> (i32, i32, i32) {
    %c0_i32 = arith.constant 0 : i32
    %c0_i32_0 = arith.constant 0 : i32
    %c0_i32_1 = arith.constant 0 : i32
    %c0_i32_2 = arith.constant 0 : i32
    return %c0_i32, %c0_i32_0, %c0_i32_1 : i32, i32, i32
  }
  func.func @transform_2(%arg0: i32, %arg1: i32) -> (i32, i32) {
    %c0_i32 = arith.constant 0 : i32
    %c0_i32_0 = arith.constant 0 : i32
    %c0_i32_1 = arith.constant 0 : i32
    return %c0_i32, %c0_i32_0 : i32, i32
  }
  func.func @transform_3(%arg0: i32, %arg1: i32) -> (i32, i32, i32) {
    %c0_i32 = arith.constant 0 : i32
    %c0_i32_0 = arith.constant 0 : i32
    return %arg0, %arg1, %c0_i32 : i32, i32, i32
  }
  func.func @transform_4(%arg0: i32, %arg1: i32) -> (i32, i32, i32) {
    %c0_i32 = arith.constant 0 : i32
    %c0_i32_0 = arith.constant 0 : i32
    %c0_i32_1 = arith.constant 0 : i32
    return %arg0, %c0_i32, %c0_i32_0 : i32, i32, i32
  }
  func.func @transform_5(%arg0: i32, %arg1: i32) -> (i32, i32, i32) {
    %c0_i32 = arith.constant 0 : i32
    %c0_i32_0 = arith.constant 0 : i32
    %c0_i32_1 = arith.constant 0 : i32
    return %arg0, %c0_i32, %c0_i32_0 : i32, i32, i32
  }
}

</mosaic_0001>

<bundles_post_ra>
// kernel: tpu_custom_call.1
= control target key start
LH: loop header
LB: loop body
LE: loop exit
PB: predicated region body
PF: predicated region fallthrough
CT: control target
= control target key end

     0   :  { %11 = vsyncpa [#allocation3], 0  ;;  %s1128_s0 = inlined_call_operand.vmem [shape: f32[2,20,8], index: 0, kind: input, shape index: {}]   ;;  %s1129_s1 = inlined_call_operand.vmem [shape: f32[5,8,128], index: 1, kind: input, shape index: {}]   ;;  %s1130_s2 = inlined_call_operand.vmem [shape: f32[1,128], index: 2, kind: input, shape index: {}]   ;;  %s1131_s3 = inlined_call_operand.vmem [shape: f32[2,12,128], index: 3, kind: output, shape index: {0}]   ;;  %s1132_s4 = inlined_call_operand.hbm [shape: f32[2,1,128], index: 4, kind: output, shape index: {1}]   ;;  %s1133_s5 = inlined_call_operand.hbm [shape: f32[2,1,128], index: 5, kind: output, shape index: {2}]  }
   0x1   :  { %13 = vsyncpa [#allocation3 + $0x1], 0 }
   0x2   :  { %14 = vsyncpa [#allocation5], 0 }
   0x3   :  { %16 = vsyncpa [#allocation5 + $0x1], 0  ;;  %s951_s18 = smov 0   ;;  %s953_s19 = smov 0  }
   0x4   :  { %s955_s20 = smov 0   ;;  %s957_s21 = smov 0  }
   0x5   :  { %s959_s22 = smov 0   ;;  %s961_s23 = smov 0  }
   0x6 LB: > { %s711_s24 = sadd.s32 4294967295, %s918_s23   ;;  %s712_s25 = sadd.s32 4294967294, %s918_s23   ;;  %s918_s23 = sphi %s961_s23, %s22_s23   ;;  %s914_s22 = sphi %s959_s22, %s1140_s22   ;;  %s910_s21 = sphi %s957_s21, %s1139_s21   ;;  %s906_s20 = sphi %s955_s20, %s1138_s20   ;;  %s902_s19 = sphi %s953_s19, %s1137_s19   ;;  %s898_s18 = sphi %s951_s18, %s1136_s18  }
   0x7   : > { %s34_s26 = sadd.s32 1, %s914_s22  ;;  %s137_s27 = sadd.s32 1, %s906_s20 }
   0x8   : > { %p36_p0 = scmp.ge.s32.totalorder %s34_s26, 2  ;;  %p147_p1 = scmp.ne.s32.totalorder %s906_s20, %s902_s19 }
   0x9   : > { %p148_p2 = scmp.eq.s32.totalorder %s711_s24, 1  ;;  %p153_p3 = scmp.ne.s32.totalorder %s902_s19, %s898_s18 }
   0xa   : > { %s1142_s26 = smov (%p36_p0, %s34_s26), 0  ;;  %p154_p5 = scmp.eq.s32.totalorder %s712_s25, 1 }
   0xb   : > { %p991_p4 = por %p148_p2, %p147_p1  ;;  %s134_s29 = ssub.s32 %s914_s22, %s1142_s26 }
   0xc   : > { %p715_p6 = scmp.ge.s32.totalorder %s918_s23, 1  ;;  %p135_p7 = scmp.eq.s32.totalorder %s134_s29, 0 }
   0xd   : > { %p998_p8 = por %p154_p5, %p153_p3  ;;  %p212_p9 = scmp.lt.s32.totalorder %s918_s23, 3 }
   0xe   : > { %s1004_s6 = scalar_select %p135_p7, %s906_s20, %s137_s27  }
   0xf   : > { %p213_p10 = pnand %p715_p6, %p212_p9 }
  0x10   : > { %p252_p11 = scmp.lt.s32.totalorder (!%p213_p10), %s910_s21, 1  ;;  %s1040_s7 = sand.u32 (!%p213_p10), 1, %s902_s19  }
  0x11   : > { %216 = sbr.rel (%p213_p10) target bundleno = 214 (0xd6), region = 32  ;;  %s1043_s8 = scalar_lea.vmem (!%p213_p10), [#allocation2], %s1040_s7 }
  0x12   : > { %s1047_s9 = scalar_lea.vmem (!%p213_p10), [#allocation4], %s1040_s7  ;;  %s554_s10 = sshll.u32 (!%p213_p10), %s1043_s8, 4  ;;  %s555_s10 = int_to_ptr.vmem [resolvable:$true] %s554_s10 }
  0x16   : > { %v721_v0 = vld [vmem:[%s1129_s1 + $0x8] sm:$0xff]  ;;  %v271_v1 = vld [vmem:[%s1129_s1] sm:$0xff]  ;;  %v728_v2 = vld [vmem:[%s1129_s1 + $0x10] sm:$0xff]  ;;  %s1023_s17 = scalar_select %p252_p11, %s910_s21, 1  ;;  %vm278_vm0 = vcmask 64512   ;;  %v920_v17 = vmov 0.0   ;;  %v491_v26 = vlaneseq }
  0x17   : > { %744 = vmatpush.msra.mxu1 %v721_v0  ;;  %364 = vmatpush.msra.mxu2 %v728_v2  ;;  %v733_v3 = vld [vmem:[%s1129_s1 + $0x18] sm:$0xff]  ;;  %v738_v4 = vld [vmem:[%s1129_s1 + $0x20] sm:$0xff]  ;;  %460 = vst [vmem:[%s1043_s8] sm:$0x1] %v920_v17 }
  0x18   : > { %300 = vmatpush.msra.mxu0 %v721_v0  ;;  %401 = vmatpush.msra.mxu3 %v733_v3  ;;  %s745_s24 = smul.u32 24, %s1023_s17  ;;  %461 = vst [vmem:[%s1047_s9] sm:$0x1] %v920_v17  ;;  %v807_v25 = vld [vmem:[%s1130_s2] ss:$0 sm:$0xff]  ;;  %s743_s12 = sshll.u32 %s1023_s17, 4  ;;  %v492_v33 = vshrl.u32 %v491_v26, 7 }
  0x19   : > { %329 = vmatpush.msrb.mxu1 %v271_v1  ;;  %s265_s15 = scalar_lea.vmem %s1131_s3, %s743_s12  ;;  %s567_s12 = sshll.u32 %s1047_s9, 4  ;;  %s1075_s12 = int_to_ptr.vmem [resolvable:$true] %s567_s12 }
  0x1a   : > { %438 = vmatpush.msrb.mxu0 %v738_v4  ;;  %s256_s29 = scalar_lea.vmem %s1128_s0, %s745_s24  ;;  %v493_v38 = vadd.s32 8, %v492_v33  ;;  %s552_s24 = scalar_lea.hbm %s1132_s4, %s910_s21 }
  0x1b   : > { %v720_v5 = vld [vmem:[%s256_s29 + $0x9] sm:$0xff]  ;;  %v719_v7 = vld [vmem:[%s256_s29 + $0x1] sm:$0xff]  ;;  %s1067_s11 = sshll.u32 %s552_s24, 4  ;;  %s828_s24 = scalar_lea.hbm %s1132_s4, 2  ;;  %s557_s11 = int_to_ptr.hbm [resolvable:$true] %s1067_s11 }
  0x1c   : > { %v726_v6 = vld [vmem:[%s256_s29 + $0x2] sm:$0xff]  ;;  %723 = vmatmul.msk.f32.vlgmr.msra.gmra.mxu1 %vm278_vm0, %v720_v5  ;;  %722 = vmatmul.msk.f32.vlgmr.msra.gmra.mxu0 %vm278_vm0, %v719_v7  ;;  %v727_v10 = vld [vmem:[%s256_s29 + $0xa] sm:$0xff]  ;;  %vm495_vm1 = vcmp.lt.s32.totalorder %v493_v38, 12  ;;  %s822_s14 = sshra.s32 %s557_s11, 4  ;;  %s823_s14 = int_to_ptr.hbm [resolvable:$true] %s822_s14 }
  0x1d   : > { %729 = vmatmul.msk.f32.vlgmr.msra.gmra.mxu2 %vm278_vm0, %v726_v6  ;;  %v731_v8 = vld [vmem:[%s256_s29 + $0x3] sm:$0xff]  ;;  %v732_v11 = vld [vmem:[%s256_s29 + $0xb] sm:$0xff]  ;;  %p829_p1 = scmp.lt.s32.totalorder %s823_s14, %s1132_s4 }
  0x1e   : > { %734 = vmatmul.msk.f32.vlgmr.msra.gmra.mxu3 %vm278_vm0, %v731_v8  ;;  %v269_v9 = vld [vmem:[%s256_s29] sm:$0xff]  ;;  %v270_v13 = vld [vmem:[%s256_s29 + $0x8] sm:$0xff] }
  0x1f   : > { %v736_v12 = vld [vmem:[%s256_s29 + $0x4] sm:$0xff]  ;;  %v737_v14 = vld [vmem:[%s256_s29 + $0xc] sm:$0xff]  ;;  %s565_s29 = scalar_lea.hbm %s1133_s5, %s910_s21  ;;  %v518_v56 = vld [vmem:[%s1043_s8] sm:$0x1]  ;;  %s536_s21 = scalar_lea.sflag [#allocation3], %s1040_s7 }
  0x20   : > { %v521_v59 = vld [vmem:[%s1047_s9] sm:$0x1]  ;;  %s1071_s13 = sshll.u32 %s565_s29, 4  ;;  %s570_s13 = int_to_ptr.hbm [resolvable:$true] %s1071_s13 }
  0x24   : > { %724 = vmatmul.msk.f32.vlgmr.msrb.gmra.mxu1 %vm278_vm0, %v269_v9  ;;  %739 = vmatmul.msk.f32.vlgmr.msrb.gmra.mxu0 %vm278_vm0, %v736_v12 }
  0x25   : > { %730 = vmatmul.msk.f32.gmra.mxu2 %vm278_vm0, %v727_v10 }
  0x26   : > { %735 = vmatmul.msk.f32.gmra.mxu3 %vm278_vm0, %v732_v11 }
  0x2c   : > { %725 = vmatmul.msk.f32.gmra.mxu1 %vm278_vm0, %v270_v13  ;;  %740 = vmatmul.msk.f32.gmra.mxu0 %vm278_vm0, %v737_v14 }
  0x99   : > { %v305_v15 = vpop.f32.mrf.mxu1  ;;  %v302_v16 = vpop.f32.mrf.mxu0 }
  0xa0   : > { %v366_v18 = vpop.f32.mrf.mxu2 }
  0xa1   : > { %v331_v19 = vpop.f32.mrf.mxu1  ;;  %v403_v20 = vpop.f32.mrf.mxu3 }
  0xa2   : > { %v332_v21 = vadd.f32 %v331_v19, %v302_v16  ;;  %v440_v22 = vpop.f32.mrf.mxu0 }
  0xa4   : > { %v372_v23 = vadd.f32 %v366_v18, %v332_v21 }
  0xa6   : > { %v409_v24 = vadd.f32 %v403_v20, %v372_v23 }
  0xa8   : > { %v446_v27 = vadd.f32 %v440_v22, %v409_v24  ;;  %v369_v29 = vpop.f32.mrf.mxu2 }
  0xa9   : > { %v334_v28 = vpop.f32.mrf.mxu1  ;;  %v406_v32 = vpop.f32.mrf.mxu3 }
  0xaa   : > { %v452_v30 = vadd.f32 %v807_v25, %v446_v27  ;;  %v335_v31 = vadd.f32 %v334_v28, %v305_v15  ;;  %v443_v36 = vpop.f32.mrf.mxu0 }
  0xac   : > { %v454_v34 = vmax.f32 %v452_v30, 0.0  ;;  %v373_v35 = vadd.f32 %v369_v29, %v335_v31 }
  0xae   : > { %v410_v37 = vadd.f32 %v406_v32, %v373_v35  ;;  %524 = vst [vmem:[%s265_s15] sm:$0xff] %v454_v34  ;;  %v509_v43 = vmul.f32 %v454_v34, %v454_v34 }
  0xb0   : > { %v447_v39 = vadd.f32 %v443_v36, %v410_v37 }
  0xb2   : > { %v453_v40 = vadd.f32 %v807_v25, %v447_v39 }
  0xb4   : > { %v455_v41 = vmax.f32 %v453_v40, 0.0 }
  0xb6   : > { %v501_v42 = vsel %vm495_vm1, %v455_v41, 0.0  ;;  %525 = vst [vmem:[%s265_s15 + $0x8] sm:$0xff] %v455_v41  ;;  %s824_s15 = scalar_lea.hbm %s823_s14, 1 }
  0xb7   : > { %v502_v44 = vadd.f32 %v501_v42, %v454_v34  ;;  %v510_v45 = vmul.f32 %v501_v42, %v501_v42  ;;  %p825_p12 = scmp.ne.s32.totalorder %s823_s14, %s824_s15  ;;  %p830_p2 = scmp.lt.s32.totalorder %s828_s24, %s824_s15 }
  0xb9   : > { %v503_v46 = vrot.slane %v502_v44, 4  ;;  %v511_v47 = vadd.f32 %v510_v45, %v509_v43  ;;  %p826_p13 = pnand %p825_p12, %p991_p4  ;;  %p831_p3 = por %p830_p2, %p829_p1 }
  0xbb   : > { %v504_v48 = vadd.f32 %v503_v46, %v502_v44  ;;  %v512_v49 = vrot.slane %v511_v47, 4  ;;  %p827_p0 = pneg %p826_p13 }
  0xbd   : > { %v505_v50 = vrot.slane %v504_v48, 2  ;;  %v513_v51 = vadd.f32 %v512_v49, %v511_v47  ;;  %p832_p5 = pnand %p831_p3, %p827_p0 }
  0xbf   : > { %v506_v52 = vadd.f32 %v505_v50, %v504_v48  ;;  %v514_v53 = vrot.slane %v513_v51, 2 }
  0xc1   : > { %v507_v54 = vrot.slane %v506_v52, 1  ;;  %v515_v55 = vadd.f32 %v514_v53, %v513_v51 }
  0xc3   : > { %v508_v57 = vadd.f32 %v507_v54, %v506_v52  ;;  %v516_v58 = vrot.slane %v515_v55, 1 }
  0xc5   : > { %v519_v60 = vadd.f32 %v518_v56, %v508_v57  ;;  %v517_v61 = vadd.f32 %v516_v58, %v515_v55 }
  0xc7   : > { %520 = vst [vmem:[%s1043_s8] sm:$0x1] %v519_v60  ;;  %v522_v62 = vadd.f32 %v521_v59, %v517_v61 }
  0xc8   : > { %835 = shalt.err (!%p832_p5)
}
  0xc9   : > { %746 = dma.vmem_to_hbm [thread:$0]  (%p991_p4), %s555_s10, 16, %s557_s11, %s536_s21   ;;  %523 = vst [vmem:[%s1047_s9] sm:$0x1] %v522_v62 }
  0xca   : > { %s540_s8 = scalar_lea.sflag [#allocation5], %s1040_s7  ;;  %s850_s29 = sshra.s32 %s570_s13, 4  ;;  %s851_s29 = int_to_ptr.hbm [resolvable:$true] %s850_s29 }
  0xcb   : > { %s852_s16 = scalar_lea.hbm %s851_s29, 1  ;;  %s856_s17 = scalar_lea.hbm %s1133_s5, 2 }
  0xcc   : > { %p853_p6 = scmp.ne.s32.totalorder %s851_s29, %s852_s16  ;;  %p857_p10 = scmp.lt.s32.totalorder %s851_s29, %s1133_s5 }
  0xcd   : > { %p858_p11 = scmp.lt.s32.totalorder %s856_s17, %s852_s16 }
  0xce   : > { %p854_p7 = pnand %p853_p6, %p991_p4 }
  0xcf   : > { %p859_p12 = por %p858_p11, %p857_p10 }
  0xd0   : > { %p855_p9 = pneg %p854_p7 }
  0xd2   : > { %p860_p13 = pnand %p859_p12, %p855_p9 }
  0xd4   : > { %863 = shalt.err (!%p860_p13)
}
  0xd5   : > { %747 = dma.vmem_to_hbm [thread:$0]  (%p991_p4), %s1075_s12, 16, %s570_s13, %s540_s8  }
  0xd6 PF: > { %p757_p0 = scmp.ge.s32.totalorder %s918_s23, 2  ;;  %s593_s7 = sand.u32 1, %s898_s18  }
  0xd7   : > { %s594_s9 = scalar_lea.sflag [#allocation3], %s593_s7 }
  0xd8   : > { %p751_p1 = pnand %p757_p0, %p998_p8 }
  0xda   : > { %p752_p2 = pneg %p751_p1 }
  0xdc   : > { %889 = dma.done.wait (%p752_p2), %s594_s9, 16  }
  0xdd   : > { %891 = vsyncadd (%p752_p2), %s594_s9, 4294967280  ;;  %s603_s10 = scalar_lea.sflag [#allocation5], %s593_s7 }
  0xde   : > { %893 = dma.done.wait (%p752_p2), %s603_s10, 16  }
  0xdf   : > { %895 = vsyncadd (%p752_p2), %s603_s10, 4294967280  ;;  %s22_s23 = sadd.s32 1, %s918_s23   ;;  %s1136_s18 = smov %s902_s19 }
  0xe0   : > { %p19_p3 = scmp.ge.s32.totalorder %s22_s23, 4   ;;  %s1137_s19 = smov %s906_s20 }
  0xe1   : > { %s1138_s20 = smov %s1004_s6  ;;  %s1139_s21 = smov %s914_s22 }
  0xe2   : > { %s1140_s22 = smov %s1142_s26  ;;  %21 = sbr.rel (!%p19_p3) target bundleno = 6 (0x6), region = 117 }
  0xe7   :  { %608 = vsyncpa [#allocation3], 1 }
  0xe8   :  { %610 = vsyncpa [#allocation3 + $0x1], 1 }
  0xe9   :  { %611 = vsyncpa [#allocation5], 1 }
  0xea   :  { %613 = vsyncpa [#allocation5 + $0x1], 1 }

</bundles_post_ra>
